<compile_context>
chip_gen: v5e
topology: v5e:2x2
jax: 0.10.0
libtpu: 0.0.40
codegen_flags: <defaults>
</compile_context>

<pallas_src>
import jax
import jax.numpy as jnp
from jax.experimental import pallas as pl
from jax.experimental.pallas import tpu as pltpu  # noqa: F401  (CompilerParams/VMEM when scaling up)

_SUBLANE = 8  # f32 sublane tile height; also the MXU minimum useful M tile.


def _lstm_regressor_kernel(x_ref,      # (T*Bp, I)  time-major, padded: row t*Bp + b == x[b, t, :]
                           w_ih_ref,   # (I, 4H)    weight_ih_l0^T, g-columns pre-scaled by 2
                           w_hh_ref,   # (H, 4H)    weight_hh_l0^T, g-columns pre-scaled by 2
                           b_ref,      # (1, 4H)    bias_ih_l0 + bias_hh_l0, g-columns pre-scaled by 2
                           w_fc_ref,   # (1, H)     fc weight (row vector)
                           b_fc_ref,   # (1, 1)     fc bias
                           out_ref):   # (Bp, 1)    output (padded, pre-squeeze)
    TB = x_ref.shape[0]
    H = w_hh_ref.shape[0]
    Bp = out_ref.shape[0]
    T = TB // Bp

    # (1) Single input projection for ALL timesteps; both biases folded in once.
    xg = (jnp.dot(x_ref[...], w_ih_ref[...], preferred_element_type=jnp.float32)
          + b_ref[...])                                            # (T*Bp, 4H)

    # Hoist the recurrent-weight load out of the loop.
    # TODO(synk): at larger H, pin this RHS in the MXU across all T steps with
    #             pltpu.matmul_push_rhs / matmul_acc_lhs / matmul_pop instead of
    #             re-pushing the identical weights every jnp.dot.
    w_hh = w_hh_ref[...]

    h = jnp.zeros((Bp, H), jnp.float32)
    c = jnp.zeros((Bp, H), jnp.float32)

    # (2) Fully unrolled recurrence (T is a small compile-time constant).  Each
    #     xg slice below is an aligned (8, 4H) tile thanks to the batch padding,
    #     so it is a free view (no sublane shuffles on the serial chain).
    # TODO(synk): for long sequences, switch to lax.fori_loop with modest unroll /
    #             stream the time axis (grid or pltpu.emit_pipeline) instead of a
    #             fully resident xg slab + full Python unroll (vreg pressure, and
    #             v7x only has 64 MiB VMEM).
    for t in range(T):
        gates = xg[t * Bp:(t + 1) * Bp, :] + jnp.dot(
            h, w_hh, preferred_element_type=jnp.float32)           # (Bp, 4H)

        # (3) ONE sigmoid over the whole gate slab.  The g-gate inputs were
        #     pre-scaled by 2 in the wrapper, so tanh(z) = 2*sigmoid(2z) - 1 is
        #     recovered with a mul-add on otherwise idle VALU slots — no extra
        #     EUP launch for the g gate.
        sig = jax.nn.sigmoid(gates)
        i_g = sig[:, 0 * H:1 * H]
        f_g = sig[:, 1 * H:2 * H]
        g_g = 2.0 * sig[:, 2 * H:3 * H] - 1.0
        o_g = sig[:, 3 * H:4 * H]

        c = f_g * c + i_g * g_g
        h = o_g * jnp.tanh(c)

    # (4) Final FC as a lane reduction (avoids an N=1 MXU matmul); fc bias folded
    #     into the epilogue once.  Padded rows are garbage and get sliced off
    #     outside the kernel.
    out_ref[...] = (jnp.sum(h * w_fc_ref[...], axis=-1, keepdims=True)
                    + b_fc_ref[...])


def _full_spec(shape):
    # No grid: each array is a single block, fully resident in VMEM.
    return pl.BlockSpec(shape, lambda: (0,) * len(shape))


@jax.jit
def lstm_regressor_forward(x, w_ih, w_hh, b_ih, b_hh, w_fc, b_fc):
    """x: (B, T, I) batch-first, float32. Returns (B,) like the PyTorch module."""
    B, T, I = x.shape
    H = w_hh.shape[1]

    # Pad batch to the f32 sublane tile so per-step work is full-occupancy and
    # every timestep slice is tile-aligned.
    B_pad = max(_SUBLANE, ((B + _SUBLANE - 1) // _SUBLANE) * _SUBLANE)

    # Time-major + batch-padded + flattened: row t*B_pad + b holds x[b, t, :].
    # Pad/transpose/reshape fuse into a single small XLA fusion ahead of the kernel.
    x_tm = jnp.zeros((T, B_pad, I), jnp.float32).at[:, :B, :].set(jnp.swapaxes(x, 0, 1))
    x_flat = x_tm.reshape(T * B_pad, I)

    # Pre-scale the g-gate columns (2H:3H) by 2 so the kernel can recover tanh from
    # the single full-slab sigmoid via tanh(z) = 2*sigmoid(2z) - 1.
    g_scale = jnp.ones((4 * H,), jnp.float32).at[2 * H:3 * H].set(2.0)
    w_ih_t = jnp.transpose(w_ih) * g_scale               # (I, 4H)
    w_hh_t = jnp.transpose(w_hh) * g_scale               # (H, 4H)
    b_sum = ((b_ih + b_hh) * g_scale).reshape(1, 4 * H)  # (1, 4H)
    w_fc_row = w_fc.reshape(1, H)                        # (1, H)
    b_fc_2d = b_fc.reshape(1, 1)                         # (1, 1)

    # TODO(synk): only add a batch-parallel grid (dimension_semantics=("parallel",))
    #             once each TensorCore would get >= 8 batch rows; at B_pad=8 a single
    #             gridless call is optimal.
    out = pl.pallas_call(
        _lstm_regressor_kernel,
        out_shape=jax.ShapeDtypeStruct((B_pad, 1), jnp.float32),
        in_specs=[
            _full_spec((T * B_pad, I)),
            _full_spec((I, 4 * H)),
            _full_spec((H, 4 * H)),
            _full_spec((1, 4 * H)),
            _full_spec((1, H)),
            _full_spec((1, 1)),
        ],
        out_specs=_full_spec((B_pad, 1)),
    )(x_flat, w_ih_t, w_hh_t, b_sum, w_fc_row, b_fc_2d)

    return out[:B, 0]                                     # drop pad rows + squeeze(-1)


def _reference_forward(x, w_ih, w_hh, b_ih, b_hh, w_fc, b_fc):
    """Pure-JAX reference mirroring torch.nn.LSTM + Linear (unmodified math)."""
    B, T, I = x.shape
    H = w_hh.shape[1]
    h = jnp.zeros((B, H), jnp.float32)
    c = jnp.zeros((B, H), jnp.float32)
    for t in range(T):
        gates = x[:, t, :] @ w_ih.T + h @ w_hh.T + b_ih + b_hh
        i_g = jax.nn.sigmoid(gates[:, 0 * H:1 * H])
        f_g = jax.nn.sigmoid(gates[:, 1 * H:2 * H])
        g_g = jnp.tanh(gates[:, 2 * H:3 * H])
        o_g = jax.nn.sigmoid(gates[:, 3 * H:4 * H])
        c = f_g * c + i_g * g_g
        h = o_g * jnp.tanh(c)
    return (h @ w_fc.T + b_fc)[:, 0]


if __name__ == "__main__":
    # Small, deterministic setup: batch=2, seq=8, input_size=4, hidden=64
    # (hidden_size=64 is the module default and makes 4H=256 = full MXU column width).
    B, T, I, H = 2, 8, 4, 64

    key = jax.random.PRNGKey(0)
    keys = jax.random.split(key, 7)
    bound = 1.0 / jnp.sqrt(jnp.float32(H))  # PyTorch default uniform init range

    x = jax.random.normal(keys[0], (B, T, I), jnp.float32)
    w_ih = jax.random.uniform(keys[1], (4 * H, I), jnp.float32, -bound, bound)
    w_hh = jax.random.uniform(keys[2], (4 * H, H), jnp.float32, -bound, bound)
    b_ih = jax.random.uniform(keys[3], (4 * H,), jnp.float32, -bound, bound)
    b_hh = jax.random.uniform(keys[4], (4 * H,), jnp.float32, -bound, bound)
    w_fc = jax.random.uniform(keys[5], (1, H), jnp.float32, -bound, bound)
    b_fc = jax.random.uniform(keys[6], (1,), jnp.float32, -bound, bound)

    out = lstm_regressor_forward(x, w_ih, w_hh, b_ih, b_hh, w_fc, b_fc)
    out = jax.block_until_ready(out)

    ref = _reference_forward(x, w_ih, w_hh, b_ih, b_hh, w_fc, b_fc)
    assert out.shape == (B,), out.shape
    # Slightly loosened vs a bitwise f32 path: the tanh-via-sigmoid fold differs by a
    # few ULPs of the EUP transcendentals per step.
    assert jnp.allclose(out, ref, atol=1e-4, rtol=1e-4), (out, ref)

    print("KERNEL_OK")
</pallas_src>

<mosaic_0001>
module attributes {stable_mosaic.version = 11 : i64} {
  func.func @_lstm_regressor_kernel(%arg0: memref<64x4xf32, #tpu.memory_space<vmem>>, %arg1: memref<4x256xf32, #tpu.memory_space<vmem>>, %arg2: memref<64x256xf32, #tpu.memory_space<vmem>>, %arg3: memref<1x256xf32, #tpu.memory_space<vmem>>, %arg4: memref<1x64xf32, #tpu.memory_space<vmem>>, %arg5: memref<1x1xf32, #tpu.memory_space<vmem>>, %arg6: memref<8x1xf32, #tpu.memory_space<vmem>>) attributes {dimension_semantics = [], scalar_prefetch = 0 : i64, scratch_operands = 0 : i64, tpu.core_type = #tpu.core_type<tc>} {
    %c0 = arith.constant 0 : index
    %c0_0 = arith.constant 0 : index
    %0 = vector.load %arg0[%c0, %c0_0] : memref<64x4xf32, #tpu.memory_space<vmem>>, vector<64x4xf32>
    %c0_1 = arith.constant 0 : index
    %c0_2 = arith.constant 0 : index
    %1 = vector.load %arg1[%c0_1, %c0_2] : memref<4x256xf32, #tpu.memory_space<vmem>>, vector<4x256xf32>
    %cst = arith.constant dense<0.000000e+00> : vector<64x256xf32>
    %2 = tpu.matmul %0, %1, %cst {dimension_numbers = #tpu.dot_dimension_numbers<[1], [0], [0], [1], [0, 0, 1, 1], [], []>} : vector<64x4xf32>, vector<4x256xf32>, vector<64x256xf32> -> vector<64x256xf32>
    %c0_3 = arith.constant 0 : index
    %c0_4 = arith.constant 0 : index
    %3 = vector.load %arg3[%c0_3, %c0_4] : memref<1x256xf32, #tpu.memory_space<vmem>>, vector<1x256xf32>
    %4 = vector.broadcast %3 : vector<1x256xf32> to vector<64x256xf32>
    %5 = arith.addf %2, %4 : vector<64x256xf32>
    %c0_5 = arith.constant 0 : index
    %c0_6 = arith.constant 0 : index
    %6 = vector.load %arg2[%c0_5, %c0_6] : memref<64x256xf32, #tpu.memory_space<vmem>>, vector<64x256xf32>
    %cst_7 = arith.constant 0.000000e+00 : f32
    %7 = vector.broadcast %cst_7 : f32 to vector<8x64xf32>
    %cst_8 = arith.constant 0.000000e+00 : f32
    %8 = vector.broadcast %cst_8 : f32 to vector<8x64xf32>
    %9 = vector.extract_strided_slice %5 {offsets = [0, 0], sizes = [8, 256], strides = [1, 1]} : vector<64x256xf32> to vector<8x256xf32>
    %cst_9 = arith.constant dense<0.000000e+00> : vector<8x256xf32>
    %10 = tpu.matmul %7, %6, %cst_9 {dimension_numbers = #tpu.dot_dimension_numbers<[1], [0], [0], [1], [0, 0, 1, 1], [], []>} : vector<8x64xf32>, vector<64x256xf32>, vector<8x256xf32> -> vector<8x256xf32>
    %11 = arith.addf %9, %10 : vector<8x256xf32>
    %12 = arith.negf %11 : vector<8x256xf32>
    %13 = math.exp %12 : vector<8x256xf32>
    %cst_10 = arith.constant 1.000000e+00 : f32
    %14 = vector.broadcast %cst_10 : f32 to vector<8x256xf32>
    %15 = arith.addf %14, %13 : vector<8x256xf32>
    %16 = arith.divf %14, %15 : vector<8x256xf32>
    %17 = vector.extract_strided_slice %16 {offsets = [0, 0], sizes = [8, 64], strides = [1, 1]} : vector<8x256xf32> to vector<8x64xf32>
    %18 = vector.extract_strided_slice %16 {offsets = [0, 64], sizes = [8, 64], strides = [1, 1]} : vector<8x256xf32> to vector<8x64xf32>
    %19 = vector.extract_strided_slice %16 {offsets = [0, 128], sizes = [8, 64], strides = [1, 1]} : vector<8x256xf32> to vector<8x64xf32>
    %cst_11 = arith.constant 2.000000e+00 : f32
    %20 = vector.broadcast %cst_11 : f32 to vector<8x64xf32>
    %21 = arith.mulf %20, %19 : vector<8x64xf32>
    %cst_12 = arith.constant 1.000000e+00 : f32
    %22 = vector.broadcast %cst_12 : f32 to vector<8x64xf32>
    %23 = arith.subf %21, %22 : vector<8x64xf32>
    %24 = vector.extract_strided_slice %16 {offsets = [0, 192], sizes = [8, 64], strides = [1, 1]} : vector<8x256xf32> to vector<8x64xf32>
    %25 = arith.mulf %18, %8 : vector<8x64xf32>
    %26 = arith.mulf %17, %23 : vector<8x64xf32>
    %27 = arith.addf %25, %26 : vector<8x64xf32>
    %28 = math.tanh %27 : vector<8x64xf32>
    %29 = arith.mulf %24, %28 : vector<8x64xf32>
    %30 = vector.extract_strided_slice %5 {offsets = [8, 0], sizes = [8, 256], strides = [1, 1]} : vector<64x256xf32> to vector<8x256xf32>
    %cst_13 = arith.constant dense<0.000000e+00> : vector<8x256xf32>
    %31 = tpu.matmul %29, %6, %cst_13 {dimension_numbers = #tpu.dot_dimension_numbers<[1], [0], [0], [1], [0, 0, 1, 1], [], []>} : vector<8x64xf32>, vector<64x256xf32>, vector<8x256xf32> -> vector<8x256xf32>
    %32 = arith.addf %30, %31 : vector<8x256xf32>
    %33 = arith.negf %32 : vector<8x256xf32>
    %34 = math.exp %33 : vector<8x256xf32>
    %cst_14 = arith.constant 1.000000e+00 : f32
    %35 = vector.broadcast %cst_14 : f32 to vector<8x256xf32>
    %36 = arith.addf %35, %34 : vector<8x256xf32>
    %37 = arith.divf %35, %36 : vector<8x256xf32>
    %38 = vector.extract_strided_slice %37 {offsets = [0, 0], sizes = [8, 64], strides = [1, 1]} : vector<8x256xf32> to vector<8x64xf32>
    %39 = vector.extract_strided_slice %37 {offsets = [0, 64], sizes = [8, 64], strides = [1, 1]} : vector<8x256xf32> to vector<8x64xf32>
    %40 = vector.extract_strided_slice %37 {offsets = [0, 128], sizes = [8, 64], strides = [1, 1]} : vector<8x256xf32> to vector<8x64xf32>
    %cst_15 = arith.constant 2.000000e+00 : f32
    %41 = vector.broadcast %cst_15 : f32 to vector<8x64xf32>
    %42 = arith.mulf %41, %40 : vector<8x64xf32>
    %cst_16 = arith.constant 1.000000e+00 : f32
    %43 = vector.broadcast %cst_16 : f32 to vector<8x64xf32>
    %44 = arith.subf %42, %43 : vector<8x64xf32>
    %45 = vector.extract_strided_slice %37 {offsets = [0, 192], sizes = [8, 64], strides = [1, 1]} : vector<8x256xf32> to vector<8x64xf32>
    %46 = arith.mulf %39, %27 : vector<8x64xf32>
    %47 = arith.mulf %38, %44 : vector<8x64xf32>
    %48 = arith.addf %46, %47 : vector<8x64xf32>
    %49 = math.tanh %48 : vector<8x64xf32>
    %50 = arith.mulf %45, %49 : vector<8x64xf32>
    %51 = vector.extract_strided_slice %5 {offsets = [16, 0], sizes = [8, 256], strides = [1, 1]} : vector<64x256xf32> to vector<8x256xf32>
    %cst_17 = arith.constant dense<0.000000e+00> : vector<8x256xf32>
    %52 = tpu.matmul %50, %6, %cst_17 {dimension_numbers = #tpu.dot_dimension_numbers<[1], [0], [0], [1], [0, 0, 1, 1], [], []>} : vector<8x64xf32>, vector<64x256xf32>, vector<8x256xf32> -> vector<8x256xf32>
    %53 = arith.addf %51, %52 : vector<8x256xf32>
    %54 = arith.negf %53 : vector<8x256xf32>
    %55 = math.exp %54 : vector<8x256xf32>
    %cst_18 = arith.constant 1.000000e+00 : f32
    %56 = vector.broadcast %cst_18 : f32 to vector<8x256xf32>
    %57 = arith.addf %56, %55 : vector<8x256xf32>
    %58 = arith.divf %56, %57 : vector<8x256xf32>
    %59 = vector.extract_strided_slice %58 {offsets = [0, 0], sizes = [8, 64], strides = [1, 1]} : vector<8x256xf32> to vector<8x64xf32>
    %60 = vector.extract_strided_slice %58 {offsets = [0, 64], sizes = [8, 64], strides = [1, 1]} : vector<8x256xf32> to vector<8x64xf32>
    %61 = vector.extract_strided_slice %58 {offsets = [0, 128], sizes = [8, 64], strides = [1, 1]} : vector<8x256xf32> to vector<8x64xf32>
    %cst_19 = arith.constant 2.000000e+00 : f32
    %62 = vector.broadcast %cst_19 : f32 to vector<8x64xf32>
    %63 = arith.mulf %62, %61 : vector<8x64xf32>
    %cst_20 = arith.constant 1.000000e+00 : f32
    %64 = vector.broadcast %cst_20 : f32 to vector<8x64xf32>
    %65 = arith.subf %63, %64 : vector<8x64xf32>
    %66 = vector.extract_strided_slice %58 {offsets = [0, 192], sizes = [8, 64], strides = [1, 1]} : vector<8x256xf32> to vector<8x64xf32>
    %67 = arith.mulf %60, %48 : vector<8x64xf32>
    %68 = arith.mulf %59, %65 : vector<8x64xf32>
    %69 = arith.addf %67, %68 : vector<8x64xf32>
    %70 = math.tanh %69 : vector<8x64xf32>
    %71 = arith.mulf %66, %70 : vector<8x64xf32>
    %72 = vector.extract_strided_slice %5 {offsets = [24, 0], sizes = [8, 256], strides = [1, 1]} : vector<64x256xf32> to vector<8x256xf32>
    %cst_21 = arith.constant dense<0.000000e+00> : vector<8x256xf32>
    %73 = tpu.matmul %71, %6, %cst_21 {dimension_numbers = #tpu.dot_dimension_numbers<[1], [0], [0], [1], [0, 0, 1, 1], [], []>} : vector<8x64xf32>, vector<64x256xf32>, vector<8x256xf32> -> vector<8x256xf32>
    %74 = arith.addf %72, %73 : vector<8x256xf32>
    %75 = arith.negf %74 : vector<8x256xf32>
    %76 = math.exp %75 : vector<8x256xf32>
    %cst_22 = arith.constant 1.000000e+00 : f32
    %77 = vector.broadcast %cst_22 : f32 to vector<8x256xf32>
    %78 = arith.addf %77, %76 : vector<8x256xf32>
    %79 = arith.divf %77, %78 : vector<8x256xf32>
    %80 = vector.extract_strided_slice %79 {offsets = [0, 0], sizes = [8, 64], strides = [1, 1]} : vector<8x256xf32> to vector<8x64xf32>
    %81 = vector.extract_strided_slice %79 {offsets = [0, 64], sizes = [8, 64], strides = [1, 1]} : vector<8x256xf32> to vector<8x64xf32>
    %82 = vector.extract_strided_slice %79 {offsets = [0, 128], sizes = [8, 64], strides = [1, 1]} : vector<8x256xf32> to vector<8x64xf32>
    %cst_23 = arith.constant 2.000000e+00 : f32
    %83 = vector.broadcast %cst_23 : f32 to vector<8x64xf32>
    %84 = arith.mulf %83, %82 : vector<8x64xf32>
    %cst_24 = arith.constant 1.000000e+00 : f32
    %85 = vector.broadcast %cst_24 : f32 to vector<8x64xf32>
    %86 = arith.subf %84, %85 : vector<8x64xf32>
    %87 = vector.extract_strided_slice %79 {offsets = [0, 192], sizes = [8, 64], strides = [1, 1]} : vector<8x256xf32> to vector<8x64xf32>
    %88 = arith.mulf %81, %69 : vector<8x64xf32>
    %89 = arith.mulf %80, %86 : vector<8x64xf32>
    %90 = arith.addf %88, %89 : vector<8x64xf32>
    %91 = math.tanh %90 : vector<8x64xf32>
    %92 = arith.mulf %87, %91 : vector<8x64xf32>
    %93 = vector.extract_strided_slice %5 {offsets = [32, 0], sizes = [8, 256], strides = [1, 1]} : vector<64x256xf32> to vector<8x256xf32>
    %cst_25 = arith.constant dense<0.000000e+00> : vector<8x256xf32>
    %94 = tpu.matmul %92, %6, %cst_25 {dimension_numbers = #tpu.dot_dimension_numbers<[1], [0], [0], [1], [0, 0, 1, 1], [], []>} : vector<8x64xf32>, vector<64x256xf32>, vector<8x256xf32> -> vector<8x256xf32>
    %95 = arith.addf %93, %94 : vector<8x256xf32>
    %96 = arith.negf %95 : vector<8x256xf32>
    %97 = math.exp %96 : vector<8x256xf32>
    %cst_26 = arith.constant 1.000000e+00 : f32
    %98 = vector.broadcast %cst_26 : f32 to vector<8x256xf32>
    %99 = arith.addf %98, %97 : vector<8x256xf32>
    %100 = arith.divf %98, %99 : vector<8x256xf32>
    %101 = vector.extract_strided_slice %100 {offsets = [0, 0], sizes = [8, 64], strides = [1, 1]} : vector<8x256xf32> to vector<8x64xf32>
    %102 = vector.extract_strided_slice %100 {offsets = [0, 64], sizes = [8, 64], strides = [1, 1]} : vector<8x256xf32> to vector<8x64xf32>
    %103 = vector.extract_strided_slice %100 {offsets = [0, 128], sizes = [8, 64], strides = [1, 1]} : vector<8x256xf32> to vector<8x64xf32>
    %cst_27 = arith.constant 2.000000e+00 : f32
    %104 = vector.broadcast %cst_27 : f32 to vector<8x64xf32>
    %105 = arith.mulf %104, %103 : vector<8x64xf32>
    %cst_28 = arith.constant 1.000000e+00 : f32
    %106 = vector.broadcast %cst_28 : f32 to vector<8x64xf32>
    %107 = arith.subf %105, %106 : vector<8x64xf32>
    %108 = vector.extract_strided_slice %100 {offsets = [0, 192], sizes = [8, 64], strides = [1, 1]} : vector<8x256xf32> to vector<8x64xf32>
    %109 = arith.mulf %102, %90 : vector<8x64xf32>
    %110 = arith.mulf %101, %107 : vector<8x64xf32>
    %111 = arith.addf %109, %110 : vector<8x64xf32>
    %112 = math.tanh %111 : vector<8x64xf32>
    %113 = arith.mulf %108, %112 : vector<8x64xf32>
    %114 = vector.extract_strided_slice %5 {offsets = [40, 0], sizes = [8, 256], strides = [1, 1]} : vector<64x256xf32> to vector<8x256xf32>
    %cst_29 = arith.constant dense<0.000000e+00> : vector<8x256xf32>
    %115 = tpu.matmul %113, %6, %cst_29 {dimension_numbers = #tpu.dot_dimension_numbers<[1], [0], [0], [1], [0, 0, 1, 1], [], []>} : vector<8x64xf32>, vector<64x256xf32>, vector<8x256xf32> -> vector<8x256xf32>
    %116 = arith.addf %114, %115 : vector<8x256xf32>
    %117 = arith.negf %116 : vector<8x256xf32>
    %118 = math.exp %117 : vector<8x256xf32>
    %cst_30 = arith.constant 1.000000e+00 : f32
    %119 = vector.broadcast %cst_30 : f32 to vector<8x256xf32>
    %120 = arith.addf %119, %118 : vector<8x256xf32>
    %121 = arith.divf %119, %120 : vector<8x256xf32>
    %122 = vector.extract_strided_slice %121 {offsets = [0, 0], sizes = [8, 64], strides = [1, 1]} : vector<8x256xf32> to vector<8x64xf32>
    %123 = vector.extract_strided_slice %121 {offsets = [0, 64], sizes = [8, 64], strides = [1, 1]} : vector<8x256xf32> to vector<8x64xf32>
    %124 = vector.extract_strided_slice %121 {offsets = [0, 128], sizes = [8, 64], strides = [1, 1]} : vector<8x256xf32> to vector<8x64xf32>
    %cst_31 = arith.constant 2.000000e+00 : f32
    %125 = vector.broadcast %cst_31 : f32 to vector<8x64xf32>
    %126 = arith.mulf %125, %124 : vector<8x64xf32>
    %cst_32 = arith.constant 1.000000e+00 : f32
    %127 = vector.broadcast %cst_32 : f32 to vector<8x64xf32>
    %128 = arith.subf %126, %127 : vector<8x64xf32>
    %129 = vector.extract_strided_slice %121 {offsets = [0, 192], sizes = [8, 64], strides = [1, 1]} : vector<8x256xf32> to vector<8x64xf32>
    %130 = arith.mulf %123, %111 : vector<8x64xf32>
    %131 = arith.mulf %122, %128 : vector<8x64xf32>
    %132 = arith.addf %130, %131 : vector<8x64xf32>
    %133 = math.tanh %132 : vector<8x64xf32>
    %134 = arith.mulf %129, %133 : vector<8x64xf32>
    %135 = vector.extract_strided_slice %5 {offsets = [48, 0], sizes = [8, 256], strides = [1, 1]} : vector<64x256xf32> to vector<8x256xf32>
    %cst_33 = arith.constant dense<0.000000e+00> : vector<8x256xf32>
    %136 = tpu.matmul %134, %6, %cst_33 {dimension_numbers = #tpu.dot_dimension_numbers<[1], [0], [0], [1], [0, 0, 1, 1], [], []>} : vector<8x64xf32>, vector<64x256xf32>, vector<8x256xf32> -> vector<8x256xf32>
    %137 = arith.addf %135, %136 : vector<8x256xf32>
    %138 = arith.negf %137 : vector<8x256xf32>
    %139 = math.exp %138 : vector<8x256xf32>
    %cst_34 = arith.constant 1.000000e+00 : f32
    %140 = vector.broadcast %cst_34 : f32 to vector<8x256xf32>
    %141 = arith.addf %140, %139 : vector<8x256xf32>
    %142 = arith.divf %140, %141 : vector<8x256xf32>
    %143 = vector.extract_strided_slice %142 {offsets = [0, 0], sizes = [8, 64], strides = [1, 1]} : vector<8x256xf32> to vector<8x64xf32>
    %144 = vector.extract_strided_slice %142 {offsets = [0, 64], sizes = [8, 64], strides = [1, 1]} : vector<8x256xf32> to vector<8x64xf32>
    %145 = vector.extract_strided_slice %142 {offsets = [0, 128], sizes = [8, 64], strides = [1, 1]} : vector<8x256xf32> to vector<8x64xf32>
    %cst_35 = arith.constant 2.000000e+00 : f32
    %146 = vector.broadcast %cst_35 : f32 to vector<8x64xf32>
    %147 = arith.mulf %146, %145 : vector<8x64xf32>
    %cst_36 = arith.constant 1.000000e+00 : f32
    %148 = vector.broadcast %cst_36 : f32 to vector<8x64xf32>
    %149 = arith.subf %147, %148 : vector<8x64xf32>
    %150 = vector.extract_strided_slice %142 {offsets = [0, 192], sizes = [8, 64], strides = [1, 1]} : vector<8x256xf32> to vector<8x64xf32>
    %151 = arith.mulf %144, %132 : vector<8x64xf32>
    %152 = arith.mulf %143, %149 : vector<8x64xf32>
    %153 = arith.addf %151, %152 : vector<8x64xf32>
    %154 = math.tanh %153 : vector<8x64xf32>
    %155 = arith.mulf %150, %154 : vector<8x64xf32>
    %156 = vector.extract_strided_slice %5 {offsets = [56, 0], sizes = [8, 256], strides = [1, 1]} : vector<64x256xf32> to vector<8x256xf32>
    %cst_37 = arith.constant dense<0.000000e+00> : vector<8x256xf32>
    %157 = tpu.matmul %155, %6, %cst_37 {dimension_numbers = #tpu.dot_dimension_numbers<[1], [0], [0], [1], [0, 0, 1, 1], [], []>} : vector<8x64xf32>, vector<64x256xf32>, vector<8x256xf32> -> vector<8x256xf32>
    %158 = arith.addf %156, %157 : vector<8x256xf32>
    %159 = arith.negf %158 : vector<8x256xf32>
    %160 = math.exp %159 : vector<8x256xf32>
    %cst_38 = arith.constant 1.000000e+00 : f32
    %161 = vector.broadcast %cst_38 : f32 to vector<8x256xf32>
    %162 = arith.addf %161, %160 : vector<8x256xf32>
    %163 = arith.divf %161, %162 : vector<8x256xf32>
    %164 = vector.extract_strided_slice %163 {offsets = [0, 0], sizes = [8, 64], strides = [1, 1]} : vector<8x256xf32> to vector<8x64xf32>
    %165 = vector.extract_strided_slice %163 {offsets = [0, 64], sizes = [8, 64], strides = [1, 1]} : vector<8x256xf32> to vector<8x64xf32>
    %166 = vector.extract_strided_slice %163 {offsets = [0, 128], sizes = [8, 64], strides = [1, 1]} : vector<8x256xf32> to vector<8x64xf32>
    %cst_39 = arith.constant 2.000000e+00 : f32
    %167 = vector.broadcast %cst_39 : f32 to vector<8x64xf32>
    %168 = arith.mulf %167, %166 : vector<8x64xf32>
    %cst_40 = arith.constant 1.000000e+00 : f32
    %169 = vector.broadcast %cst_40 : f32 to vector<8x64xf32>
    %170 = arith.subf %168, %169 : vector<8x64xf32>
    %171 = vector.extract_strided_slice %163 {offsets = [0, 192], sizes = [8, 64], strides = [1, 1]} : vector<8x256xf32> to vector<8x64xf32>
    %172 = arith.mulf %165, %153 : vector<8x64xf32>
    %173 = arith.mulf %164, %170 : vector<8x64xf32>
    %174 = arith.addf %172, %173 : vector<8x64xf32>
    %175 = math.tanh %174 : vector<8x64xf32>
    %176 = arith.mulf %171, %175 : vector<8x64xf32>
    %c0_41 = arith.constant 0 : index
    %c0_42 = arith.constant 0 : index
    %177 = vector.load %arg4[%c0_41, %c0_42] : memref<1x64xf32, #tpu.memory_space<vmem>>, vector<1x64xf32>
    %178 = vector.broadcast %177 : vector<1x64xf32> to vector<8x64xf32>
    %179 = arith.mulf %176, %178 : vector<8x64xf32>
    %cst_43 = arith.constant dense<0.000000e+00> : vector<8xf32>
    %180 = vector.multi_reduction <add>, %179, %cst_43 [1] : vector<8x64xf32> to vector<8xf32>
    %181 = vector.shape_cast %180 : vector<8xf32> to vector<8x1xf32>
    %c0_44 = arith.constant 0 : index
    %c0_45 = arith.constant 0 : index
    %182 = vector.load %arg5[%c0_44, %c0_45] : memref<1x1xf32, #tpu.memory_space<vmem>>, vector<1x1xf32>
    %183 = vector.broadcast %182 : vector<1x1xf32> to vector<8x1xf32>
    %184 = arith.addf %181, %183 : vector<8x1xf32>
    %c0_46 = arith.constant 0 : index
    %c0_47 = arith.constant 0 : index
    %185 = vector.load %arg6[%c0_46, %c0_47] : memref<8x1xf32, #tpu.memory_space<vmem>>, vector<8x1xf32>
    tpu.vector_store %arg6[%c0_46, %c0_47], %184 {strides = array<i32>} : memref<8x1xf32, #tpu.memory_space<vmem>>, vector<8x1xf32>,
    return
  }
}

</mosaic_0001>

<bundles_post_ra>
// kernel: lstm_regressor_forward.1
= control target key start
LH: loop header
LB: loop body
LE: loop exit
PB: predicated region body
PF: predicated region fallthrough
CT: control target
= control target key end

     0   :  { %vm69_vm0 = vcmask 1043456   ;;  %vm44_vm1 = vcmask 31744   ;;  %v1104_v20 = vmov 0.0   ;;  %vm172_vm10 = vcmask 523264   ;;  %s1490_s2 = inlined_call_operand.vmem [shape: f32[64,256], index: 2, kind: input, shape index: {}]   ;;  %s1491_s1 = inlined_call_operand.vmem [shape: f32[4,256], index: 1, kind: input, shape index: {}]   ;;  %s1492_s0 = inlined_call_operand.vmem [shape: f32[64,4], index: 0, kind: input, shape index: {}]   ;;  %s1493_s3 = inlined_call_operand.vmem [shape: f32[1,256], index: 3, kind: input, shape index: {}]   ;;  %s1494_s4 = inlined_call_operand.vmem [shape: f32[1,64], index: 4, kind: input, shape index: {}]   ;;  %s1495_s5 = inlined_call_operand.<no memory space> [shape: f32[1,1], index: 5, kind: input, shape index: {}]   ;;  %s1496_s6 = inlined_call_operand.vmem [shape: f32[8,1], index: 6, kind: output, shape index: {}]  }
   0x1   :  { %v1144_v0 = vld [vmem:[%s1490_s2 + $0x70] sm:$0xff]  ;;  %v1149_v1 = vld [vmem:[%s1490_s2 + $0x78] sm:$0xff]  ;;  %v1154_v2 = vld [vmem:[%s1490_s2 + $0x60] sm:$0xff] }
   0x2   :  { %184 = vmatpush.msra.mxu2 %v1144_v0  ;;  %204 = vmatpush.msra.mxu3 %v1149_v1  ;;  %v1161_v3 = vld [vmem:[%s1490_s2 + $0x68] sm:$0xff]  ;;  %v1166_v4 = vld [vmem:[%s1490_s2 + $0x50] sm:$0xff]  ;;  %v1171_v5 = vld [vmem:[%s1490_s2 + $0x58] sm:$0xff] }
   0x3   :  { %v1178_v6 = vld [vmem:[%s1490_s2 + $0x40] sm:$0xff]  ;;  %v1183_v7 = vld [vmem:[%s1490_s2 + $0x48] sm:$0xff]  ;;  %v1193_v9 = vld [vmem:[%s1490_s2 + $0x30] sm:$0xff] }
   0x4   :  { %185 = vmatpush.msra.mxu2 %v1154_v2  ;;  %205 = vmatpush.msra.mxu3 %v1161_v3  ;;  %v33_v8 = vld [vmem:[%s1491_s1] sm:$0xff]  ;;  %v1198_v10 = vld [vmem:[%s1490_s2 + $0x38] sm:$0xff]  ;;  %v1210_v12 = vld [vmem:[%s1490_s2 + $0x28] sm:$0xff] }
   0x5   :  { %41 = vst [vmem:[#allocation1] ss:$2 sm:$0xff] %v33_v8  ;;  %v1205_v11 = vld [vmem:[%s1490_s2 + $0x20] sm:$0xff]  ;;  %v1217_v13 = vld [vmem:[%s1490_s2 + $0x10] sm:$0xff]  ;;  %v1222_v14 = vld [vmem:[%s1490_s2 + $0x18] sm:$0xff] }
   0x6   :  { %186 = vmatpush.msra.mxu2 %v1166_v4  ;;  %206 = vmatpush.msra.mxu3 %v1171_v5  ;;  %v1229_v15 = vld [vmem:[%s1490_s2] sm:$0xff]  ;;  %v1234_v16 = vld [vmem:[%s1490_s2 + $0x8] sm:$0xff] }
   0x7   :  { %v25_v19 = vld [vmem:[%s1492_s0] sm:$0xff] }
   0x8   :  { %187 = vmatpush.msra.mxu2 %v1178_v6  ;;  %207 = vmatpush.msra.mxu3 %v1183_v7  ;;  %v34_v21 = vld [vmem:[%s1493_s3] sm:$0x3]  ;;  %s1105_s3 = smov 64  }
   0x9   :  { %v1312_v22 = vperm.slane %v34_v21, 0  ;;  %v1314_v23 = vperm.slane %v34_v21, 1 }
   0xa   :  { %188 = vmatpush.msra.mxu2 %v1193_v9  ;;  %208 = vmatpush.msra.mxu3 %v1198_v10 }
   0xc   :  { %189 = vmatpush.msra.mxu2 %v1205_v11  ;;  %209 = vmatpush.msra.mxu3 %v1210_v12  ;;  %v42_v17 = vld.sshfl [vmem:[#allocation1] sm:$0xff pattern:$0x75316420]  ;;  %v43_v18 = vld.sshfl [vmem:[#allocation1 + $0x8] sm:$0xff pattern:$0x75316420] }
   0xd   :  { %964 = vmatpush.msk.msra.mxu0 %vm69_vm0, %v42_v17  ;;  %973 = vmatpush.msk.msra.mxu1 %vm69_vm0, %v43_v18  ;;  %v26_v18 = vld [vmem:[%s1492_s0 + $0x8] sm:$0xff] }
   0xe   :  { %190 = vmatpush.msra.mxu2 %v1217_v13  ;;  %210 = vmatpush.msra.mxu3 %v1222_v14 }
   0xf   :  { %965 = vmatmul.msk.f32.vlgmr.msra.gmra.mxu0 %vm44_vm1, %v25_v19  ;;  %974 = vmatmul.msk.f32.vlgmr.msra.gmra.mxu1 %vm44_vm1, %v25_v19 }
  0x10   :  { %191 = vmatpush.msra.mxu2 %v1229_v15  ;;  %211 = vmatpush.msra.mxu3 %v1234_v16 }
  0x11   :  { %192 = vmatmul.f32.vlgmr.msra.gmra.mxu2 %v1104_v20  ;;  %212 = vmatmul.f32.vlgmr.msra.gmra.mxu3 %v1104_v20 }
  0x12   :  { %280 = vmatpush.msrb.mxu2 %v1144_v0  ;;  %300 = vmatpush.msrb.mxu3 %v1149_v1 }
  0x13   :  { %588 = vmatpush.msrb.mxu1 %v1149_v1  ;;  %568 = vmatpush.msrb.mxu0 %v1144_v0 }
  0x14   :  { %281 = vmatpush.msrb.mxu2 %v1154_v2  ;;  %301 = vmatpush.msrb.mxu3 %v1161_v3 }
  0x15   :  { %589 = vmatpush.msrb.mxu1 %v1161_v3  ;;  %569 = vmatpush.msrb.mxu0 %v1154_v2 }
  0x16   :  { %282 = vmatpush.msrb.mxu2 %v1166_v4  ;;  %302 = vmatpush.msrb.mxu3 %v1171_v5 }
  0x17   :  { %590 = vmatpush.msrb.mxu1 %v1171_v5  ;;  %570 = vmatpush.msrb.mxu0 %v1166_v4 }
  0x18   :  { %283 = vmatpush.msrb.mxu2 %v1178_v6  ;;  %303 = vmatpush.msrb.mxu3 %v1183_v7 }
  0x19   :  { %591 = vmatpush.msrb.mxu1 %v1183_v7  ;;  %571 = vmatpush.msrb.mxu0 %v1178_v6 }
  0x1a   :  { %284 = vmatpush.msrb.mxu2 %v1193_v9  ;;  %304 = vmatpush.msrb.mxu3 %v1198_v10 }
  0x1b   :  { %592 = vmatpush.msrb.mxu1 %v1198_v10  ;;  %572 = vmatpush.msrb.mxu0 %v1193_v9 }
  0x1c   :  { %285 = vmatpush.msrb.mxu2 %v1205_v11  ;;  %305 = vmatpush.msrb.mxu3 %v1210_v12 }
  0x1d   :  { %593 = vmatpush.msrb.mxu1 %v1210_v12  ;;  %573 = vmatpush.msrb.mxu0 %v1205_v11 }
  0x1e   :  { %286 = vmatpush.msrb.mxu2 %v1217_v13  ;;  %306 = vmatpush.msrb.mxu3 %v1222_v14 }
  0x1f   :  { %594 = vmatpush.msrb.mxu1 %v1222_v14  ;;  %574 = vmatpush.msrb.mxu0 %v1217_v13 }
  0x20   :  { %287 = vmatpush.msrb.mxu2 %v1229_v15  ;;  %307 = vmatpush.msrb.mxu3 %v1234_v16 }
  0x21   :  { %595 = vmatpush.msrb.mxu1 %v1234_v16  ;;  %575 = vmatpush.msrb.mxu0 %v1229_v15 }
  0x22   :  { %376 = vmatpush.msra.mxu2 %v1144_v0  ;;  %396 = vmatpush.msra.mxu3 %v1149_v1 }
  0x23   :  { %760 = vmatpush.msra.mxu0 %v1144_v0  ;;  %780 = vmatpush.msra.mxu1 %v1149_v1 }
  0x24   :  { %377 = vmatpush.msra.mxu2 %v1154_v2  ;;  %397 = vmatpush.msra.mxu3 %v1161_v3 }
  0x25   :  { %761 = vmatpush.msra.mxu0 %v1154_v2  ;;  %781 = vmatpush.msra.mxu1 %v1161_v3 }
  0x26   :  { %378 = vmatpush.msra.mxu2 %v1166_v4  ;;  %398 = vmatpush.msra.mxu3 %v1171_v5 }
  0x27   :  { %762 = vmatpush.msra.mxu0 %v1166_v4  ;;  %782 = vmatpush.msra.mxu1 %v1171_v5 }
  0x28   :  { %379 = vmatpush.msra.mxu2 %v1178_v6  ;;  %399 = vmatpush.msra.mxu3 %v1183_v7 }
  0x29   :  { %763 = vmatpush.msra.mxu0 %v1178_v6  ;;  %783 = vmatpush.msra.mxu1 %v1183_v7 }
  0x2a   :  { %380 = vmatpush.msra.mxu2 %v1193_v9  ;;  %400 = vmatpush.msra.mxu3 %v1198_v10 }
  0x2b   :  { %764 = vmatpush.msra.mxu0 %v1193_v9  ;;  %784 = vmatpush.msra.mxu1 %v1198_v10 }
  0x2c   :  { %381 = vmatpush.msra.mxu2 %v1205_v11  ;;  %401 = vmatpush.msra.mxu3 %v1210_v12 }
  0x2d   :  { %765 = vmatpush.msra.mxu0 %v1205_v11  ;;  %785 = vmatpush.msra.mxu1 %v1210_v12 }
  0x2e   :  { %382 = vmatpush.msra.mxu2 %v1217_v13  ;;  %402 = vmatpush.msra.mxu3 %v1222_v14 }
  0x2f   :  { %766 = vmatpush.msra.mxu0 %v1217_v13  ;;  %786 = vmatpush.msra.mxu1 %v1222_v14 }
  0x30   :  { %383 = vmatpush.msra.mxu2 %v1229_v15  ;;  %403 = vmatpush.msra.mxu3 %v1234_v16 }
  0x31   :  { %767 = vmatpush.msra.mxu0 %v1229_v15  ;;  %787 = vmatpush.msra.mxu1 %v1234_v16 }
  0x32   :  { %966 = vmatmul.msk.f32.gmra.mxu0 %vm44_vm1, %v26_v18  ;;  %975 = vmatmul.msk.f32.gmra.mxu1 %vm44_vm1, %v26_v18 }
  0x8c   :  { %v91_v24 = vpop.f32.mrf.mxu0  ;;  %v132_v25 = vpop.f32.mrf.mxu1 }
  0x8d   :  { %v92_v26 = vadd.f32 %v91_v24, %v1312_v22  ;;  %v133_v27 = vadd.f32 %v132_v25, %v1314_v23 }
  0x94   :  { %v193_v28 = vpop.f32.mrf.mxu2  ;;  %v213_v29 = vpop.f32.mrf.mxu3 }
  0x95   :  { %v216_v30 = vadd.f32 %v193_v28, %v92_v26  ;;  %v217_v31 = vadd.f32 %v213_v29, %v133_v27 }
  0x97   :  { %v982_v32 = vmul.f32 -1.442695, %v216_v30  ;;  %v983_v33 = vmul.f32 -1.442695, %v217_v31 }
  0x99   :  { %1024 = vpow2.f32 %v982_v32 }
  0x9a   :  { %1026 = vpow2.f32 %v983_v33 }
  0x9f   :  { %v1025_v34 = vpop.eup %1024 }
  0xa0   :  { %v1027_v35 = vpop.eup %1026  ;;  %v224_v36 = vadd.f32 1.0, %v1025_v34 }
  0xa1   :  { %v225_v37 = vadd.f32 1.0, %v1027_v35 }
  0xa2   :  { %1028 = vrcp.f32 %v224_v36  ;;  %v237_v50 = vand.u32 2147483648, %v224_v36  ;;  %vm231_vm6 = vweird.f32 %v224_v36  ;;  %v235_v52 = vand.u32 2147483647, %v224_v36 }
  0xa3   :  { %1030 = vrcp.f32 %v225_v37  ;;  %v252_v45 = vand.u32 2147483648, %v225_v37  ;;  %v250_v47 = vand.u32 2147483647, %v225_v37  ;;  %vm246_vm4 = vweird.f32 %v225_v37 }
  0xa4   :  { %v238_v57 = vor.u32 1.1754944e-38, %v237_v50  ;;  %vm236_vm9 = vcmp.eq.f32.partialorder %v235_v52, 8.507059e+37 }
  0xa5   :  { %v253_v51 = vor.u32 1.1754944e-38, %v252_v45  ;;  %vm251_vm7 = vcmp.eq.f32.partialorder %v250_v47, 8.507059e+37 }
  0xa8   :  { %v1029_v38 = vpop.eup %1028 }
  0xa9   :  { %v1031_v39 = vpop.eup %1030  ;;  %v227_v40 = vmul.f32 %v1029_v38, %v224_v36  ;;  %vm232_vm3 = vweird.f32 %v1029_v38 }
  0xaa   :  { %v242_v41 = vmul.f32 %v1031_v39, %v225_v37  ;;  %vm247_vm2 = vweird.f32 %v1031_v39  ;;  %vm233_vm8 = vmor %vm231_vm6, %vm232_vm3 }
  0xab   :  { %v228_v42 = vsub.f32 1.0, %v227_v40  ;;  %vm248_vm5 = vmor %vm246_vm4, %vm247_vm2 }
  0xac   :  { %v243_v43 = vsub.f32 1.0, %v242_v41 }
  0xad   :  { %v229_v44 = vmul.f32 %v1029_v38, %v228_v42 }
  0xae   :  { %v244_v46 = vmul.f32 %v1031_v39, %v243_v43 }
  0xaf   :  { %v230_v48 = vadd.f32 %v1029_v38, %v229_v44  ;;  %v94_v20 = vpop.f32.mrf.mxu0  ;;  %v135_v21 = vpop.f32.mrf.mxu1 }
  0xb0   :  { %v245_v49 = vadd.f32 %v1031_v39, %v244_v46  ;;  %v95_v24 = vadd.f32 %v94_v20, %v1312_v22  ;;  %v136_v25 = vadd.f32 %v135_v21, %v1314_v23 }
  0xb1   :  { %v234_v55 = vsel %vm233_vm8, %v1029_v38, %v230_v48 }
  0xb2   :  { %v249_v53 = vsel %vm248_vm5, %v1031_v39, %v245_v49  ;;  %v239_v59 = vsel %vm236_vm9, %v238_v57, %v234_v55 }
  0xb3   :  { %v254_v54 = vsel %vm251_vm7, %v253_v51, %v249_v53  ;;  %v258_v61 = vmul.f32 0.0, %v239_v59 }
  0xb4   :  { %v256_v56 = vmul.f32 2.0, %v254_v54 }
  0xb6   :  { %v984_v58 = vadd.f32 -1.0, %v256_v56 }
  0xb8   :  { %v259_v60 = vmul.f32 %v984_v58, %v239_v59 }
  0xba   :  { %261 = vrot.lane.b32.xlu0 %v259_v60, %s1105_s3 }
 0x12c   :  { %v262_v62 = vpop.permute.xlu0 %261 }
 0x12d   :  { %v1319_v63 = vadd.f32 %v262_v62, %v258_v61 }
 0x12f   :  { %1032 = vtanh.f32 %v1319_v63 }
 0x135   :  { %v1033_v8 = vpop.eup %1032 }
 0x136   :  { %v266_v17 = vmul.f32 %v1033_v8, %v254_v54 }
 0x138   :  { %268 = vrot.lane.b32.xlu0 %v266_v17, %s1105_s3  ;;  %v27_v17 = vld [vmem:[%s1492_s0 + $0x10] sm:$0xff] }
 0x139   :  { %967 = vmatmul.msk.f32.gmra.mxu0 %vm44_vm1, %v27_v17  ;;  %976 = vmatmul.msk.f32.gmra.mxu1 %vm44_vm1, %v27_v17 }
 0x1aa   :  { %v269_v19 = vpop.permute.xlu0 %268 }
 0x1ab   :  { %985 = vmatmul.msk.f32.vlgmr.msrb.gmra.mxu2 %vm172_vm10, %v269_v19  ;;  %986 = vmatmul.msk.f32.vlgmr.msrb.gmra.mxu3 %vm172_vm10, %v269_v19 }
 0x1ac   :  { %472 = vmatpush.msrb.mxu2 %v1144_v0  ;;  %492 = vmatpush.msrb.mxu3 %v1149_v1 }
 0x1ae   :  { %473 = vmatpush.msrb.mxu2 %v1154_v2  ;;  %493 = vmatpush.msrb.mxu3 %v1161_v3 }
 0x1b0   :  { %474 = vmatpush.msrb.mxu2 %v1166_v4  ;;  %494 = vmatpush.msrb.mxu3 %v1171_v5 }
 0x1b2   :  { %475 = vmatpush.msrb.mxu2 %v1178_v6  ;;  %495 = vmatpush.msrb.mxu3 %v1183_v7 }
 0x1b4   :  { %476 = vmatpush.msrb.mxu2 %v1193_v9  ;;  %496 = vmatpush.msrb.mxu3 %v1198_v10 }
 0x1b6   :  { %477 = vmatpush.msrb.mxu2 %v1205_v11  ;;  %497 = vmatpush.msrb.mxu3 %v1210_v12  ;;  %v138_v19 = vpop.f32.mrf.mxu1 }
 0x1b7   :  { %v139_v21 = vadd.f32 %v138_v19, %v1314_v23 }
 0x1b8   :  { %478 = vmatpush.msrb.mxu2 %v1217_v13  ;;  %498 = vmatpush.msrb.mxu3 %v1222_v14 }
 0x1ba   :  { %479 = vmatpush.msrb.mxu2 %v1229_v15  ;;  %499 = vmatpush.msrb.mxu3 %v1234_v16 }
 0x22e   :  { %v289_v26 = vpop.f32.mrf.mxu2  ;;  %v309_v27 = vpop.f32.mrf.mxu3 }
 0x22f   :  { %v312_v28 = vadd.f32 %v289_v26, %v95_v24  ;;  %v313_v29 = vadd.f32 %v309_v27, %v136_v25 }
 0x231   :  { %v987_v30 = vmul.f32 -1.442695, %v312_v28  ;;  %v988_v31 = vmul.f32 -1.442695, %v313_v29 }
 0x233   :  { %1034 = vpow2.f32 %v987_v30 }
 0x234   :  { %1036 = vpow2.f32 %v988_v31 }
 0x239   :  { %v1035_v32 = vpop.eup %1034 }
 0x23a   :  { %v1037_v33 = vpop.eup %1036  ;;  %v320_v34 = vadd.f32 1.0, %v1035_v32 }
 0x23b   :  { %v321_v35 = vadd.f32 1.0, %v1037_v33 }
 0x23c   :  { %1038 = vrcp.f32 %v320_v34  ;;  %v333_v48 = vand.u32 2147483648, %v320_v34  ;;  %vm327_vm15 = vweird.f32 %v320_v34  ;;  %v331_v50 = vand.u32 2147483647, %v320_v34 }
 0x23d   :  { %1040 = vrcp.f32 %v321_v35  ;;  %v348_v43 = vand.u32 2147483648, %v321_v35  ;;  %v346_v45 = vand.u32 2147483647, %v321_v35  ;;  %vm342_vm13 = vweird.f32 %v321_v35 }
 0x23e   :  { %v334_v55 = vor.u32 1.1754944e-38, %v333_v48  ;;  %vm332_vm3 = vcmp.eq.f32.partialorder %v331_v50, 8.507059e+37 }
 0x23f   :  { %v349_v49 = vor.u32 1.1754944e-38, %v348_v43  ;;  %vm347_vm0 = vcmp.eq.f32.partialorder %v346_v45, 8.507059e+37 }
 0x242   :  { %v1039_v36 = vpop.eup %1038 }
 0x243   :  { %v1041_v37 = vpop.eup %1040  ;;  %v323_v38 = vmul.f32 %v1039_v36, %v320_v34  ;;  %vm328_vm12 = vweird.f32 %v1039_v36 }
 0x244   :  { %v338_v39 = vmul.f32 %v1041_v37, %v321_v35  ;;  %vm343_vm11 = vweird.f32 %v1041_v37  ;;  %vm329_vm2 = vmor %vm327_vm15, %vm328_vm12 }
 0x245   :  { %v324_v40 = vsub.f32 1.0, %v323_v38  ;;  %vm344_vm14 = vmor %vm342_vm13, %vm343_vm11 }
 0x246   :  { %v339_v41 = vsub.f32 1.0, %v338_v39 }
 0x247   :  { %v325_v42 = vmul.f32 %v1039_v36, %v324_v40 }
 0x248   :  { %v340_v44 = vmul.f32 %v1041_v37, %v339_v41 }
 0x249   :  { %v326_v46 = vadd.f32 %v1039_v36, %v325_v42 }
 0x24a   :  { %v341_v47 = vadd.f32 %v1041_v37, %v340_v44 }
 0x24b   :  { %v330_v53 = vsel %vm329_vm2, %v1039_v36, %v326_v46 }
 0x24c   :  { %v345_v51 = vsel %vm344_vm14, %v1041_v37, %v341_v47  ;;  %v335_v57 = vsel %vm332_vm3, %v334_v55, %v330_v53 }
 0x24d   :  { %v350_v52 = vsel %vm347_vm0, %v349_v49, %v345_v51  ;;  %v354_v59 = vmul.f32 %v335_v57, %v1319_v63  ;;  %v97_v63 = vpop.f32.mrf.mxu0 }
 0x24e   :  { %v352_v54 = vmul.f32 2.0, %v350_v52  ;;  %v98_v20 = vadd.f32 %v97_v63, %v1312_v22 }
 0x250   :  { %v989_v56 = vadd.f32 -1.0, %v352_v54 }
 0x252   :  { %v355_v58 = vmul.f32 %v989_v56, %v335_v57 }
 0x254   :  { %357 = vrot.lane.b32.xlu1 %v355_v58, %s1105_s3 }
 0x2c6   :  { %v358_v60 = vpop.permute.xlu1 %357 }
 0x2c7   :  { %v1350_v61 = vadd.f32 %v358_v60, %v354_v59 }
 0x2c9   :  { %1042 = vtanh.f32 %v1350_v61 }
 0x2cf   :  { %v1043_v62 = vpop.eup %1042 }
 0x2d0   :  { %v362_v8 = vmul.f32 %v1043_v62, %v350_v52 }
 0x2d2   :  { %364 = vrot.lane.b32.xlu1 %v362_v8, %s1105_s3  ;;  %v28_v8 = vld [vmem:[%s1492_s0 + $0x18] sm:$0xff] }
 0x2d3   :  { %968 = vmatmul.msk.f32.gmra.mxu0 %vm44_vm1, %v28_v8  ;;  %977 = vmatmul.msk.f32.gmra.mxu1 %vm44_vm1, %v28_v8 }
 0x344   :  { %v365_v18 = vpop.permute.xlu1 %364 }
 0x345   :  { %990 = vmatmul.msk.f32.vlgmr.msra.gmra.mxu2 %vm172_vm10, %v365_v18  ;;  %991 = vmatmul.msk.f32.vlgmr.msra.gmra.mxu3 %vm172_vm10, %v365_v18 }
 0x346   :  { %664 = vmatpush.msra.mxu2 %v1144_v0  ;;  %684 = vmatpush.msra.mxu3 %v1149_v1 }
 0x348   :  { %665 = vmatpush.msra.mxu2 %v1154_v2  ;;  %685 = vmatpush.msra.mxu3 %v1161_v3 }
 0x34a   :  { %666 = vmatpush.msra.mxu2 %v1166_v4  ;;  %686 = vmatpush.msra.mxu3 %v1171_v5 }
 0x34c   :  { %667 = vmatpush.msra.mxu2 %v1178_v6  ;;  %687 = vmatpush.msra.mxu3 %v1183_v7 }
 0x34e   :  { %668 = vmatpush.msra.mxu2 %v1193_v9  ;;  %688 = vmatpush.msra.mxu3 %v1198_v10 }
 0x350   :  { %669 = vmatpush.msra.mxu2 %v1205_v11  ;;  %689 = vmatpush.msra.mxu3 %v1210_v12 }
 0x352   :  { %670 = vmatpush.msra.mxu2 %v1217_v13  ;;  %690 = vmatpush.msra.mxu3 %v1222_v14 }
 0x354   :  { %671 = vmatpush.msra.mxu2 %v1229_v15  ;;  %691 = vmatpush.msra.mxu3 %v1234_v16 }
 0x3c8   :  { %v385_v24 = vpop.f32.mrf.mxu2  ;;  %v405_v25 = vpop.f32.mrf.mxu3 }
 0x3c9   :  { %v408_v26 = vadd.f32 %v385_v24, %v98_v20  ;;  %v409_v27 = vadd.f32 %v405_v25, %v139_v21 }
 0x3cb   :  { %v992_v28 = vmul.f32 -1.442695, %v408_v26  ;;  %v993_v29 = vmul.f32 -1.442695, %v409_v27 }
 0x3cd   :  { %1044 = vpow2.f32 %v992_v28 }
 0x3ce   :  { %1046 = vpow2.f32 %v993_v29 }
 0x3d3   :  { %v1045_v30 = vpop.eup %1044 }
 0x3d4   :  { %v1047_v31 = vpop.eup %1046  ;;  %v416_v32 = vadd.f32 1.0, %v1045_v30 }
 0x3d5   :  { %v417_v33 = vadd.f32 1.0, %v1047_v31 }
 0x3d6   :  { %1048 = vrcp.f32 %v416_v32  ;;  %v429_v46 = vand.u32 2147483648, %v416_v32  ;;  %vm423_vm8 = vweird.f32 %v416_v32  ;;  %v427_v48 = vand.u32 2147483647, %v416_v32 }
 0x3d7   :  { %1050 = vrcp.f32 %v417_v33  ;;  %v444_v41 = vand.u32 2147483648, %v417_v33  ;;  %v442_v43 = vand.u32 2147483647, %v417_v33  ;;  %vm438_vm6 = vweird.f32 %v417_v33 }
 0x3d8   :  { %v430_v53 = vor.u32 1.1754944e-38, %v429_v46  ;;  %vm428_vm12 = vcmp.eq.f32.partialorder %v427_v48, 8.507059e+37 }
 0x3d9   :  { %v445_v47 = vor.u32 1.1754944e-38, %v444_v41  ;;  %vm443_vm9 = vcmp.eq.f32.partialorder %v442_v43, 8.507059e+37  ;;  %v31_v41 = vld [vmem:[%s1492_s0 + $0x30] sm:$0xff] }
 0x3dc   :  { %v1049_v34 = vpop.eup %1048 }
 0x3dd   :  { %v1051_v35 = vpop.eup %1050  ;;  %v419_v36 = vmul.f32 %v1049_v34, %v416_v32  ;;  %vm424_vm5 = vweird.f32 %v1049_v34 }
 0x3de   :  { %v434_v37 = vmul.f32 %v1051_v35, %v417_v33  ;;  %vm439_vm4 = vweird.f32 %v1051_v35  ;;  %vm425_vm11 = vmor %vm423_vm8, %vm424_vm5 }
 0x3df   :  { %v420_v38 = vsub.f32 1.0, %v419_v36  ;;  %vm440_vm7 = vmor %vm438_vm6, %vm439_vm4 }
 0x3e0   :  { %v435_v39 = vsub.f32 1.0, %v434_v37 }
 0x3e1   :  { %v421_v40 = vmul.f32 %v1049_v34, %v420_v38 }
 0x3e2   :  { %v436_v42 = vmul.f32 %v1051_v35, %v435_v39  ;;  %v29_v39 = vld [vmem:[%s1492_s0 + $0x20] sm:$0xff] }
 0x3e3   :  { %v422_v44 = vadd.f32 %v1049_v34, %v421_v40  ;;  %969 = vmatmul.msk.f32.gmra.mxu0 %vm44_vm1, %v29_v39  ;;  %978 = vmatmul.msk.f32.gmra.mxu1 %vm44_vm1, %v29_v39  ;;  %v30_v40 = vld [vmem:[%s1492_s0 + $0x28] sm:$0xff] }
 0x3e4   :  { %v437_v45 = vadd.f32 %v1051_v35, %v436_v42 }
 0x3e5   :  { %v426_v51 = vsel %vm425_vm11, %v1049_v34, %v422_v44 }
 0x3e6   :  { %v441_v49 = vsel %vm440_vm7, %v1051_v35, %v437_v45  ;;  %v431_v55 = vsel %vm428_vm12, %v430_v53, %v426_v51  ;;  %v32_v45 = vld [vmem:[%s1492_s0 + $0x38] sm:$0xff] }
 0x3e7   :  { %v446_v50 = vsel %vm443_vm9, %v445_v47, %v441_v49  ;;  %v450_v57 = vmul.f32 %v431_v55, %v1350_v61 }
 0x3e8   :  { %v448_v52 = vmul.f32 2.0, %v446_v50 }
 0x3ea   :  { %v994_v54 = vadd.f32 -1.0, %v448_v52 }
 0x3eb   :  { %970 = vmatmul.msk.f32.gmra.mxu0 %vm44_vm1, %v30_v40  ;;  %979 = vmatmul.msk.f32.gmra.mxu1 %vm44_vm1, %v30_v40 }
 0x3ec   :  { %v451_v56 = vmul.f32 %v994_v54, %v431_v55 }
 0x3ee   :  { %453 = vrot.lane.b32.xlu2 %v451_v56, %s1105_s3 }
 0x3f3   :  { %971 = vmatmul.msk.f32.gmra.mxu0 %vm44_vm1, %v31_v41  ;;  %980 = vmatmul.msk.f32.gmra.mxu1 %vm44_vm1, %v31_v41 }
 0x3fb   :  { %972 = vmatmul.msk.f32.gmra.mxu0 %vm44_vm1, %v32_v45  ;;  %981 = vmatmul.msk.f32.gmra.mxu1 %vm44_vm1, %v32_v45 }
 0x448   :  { %v454_v58 = vpop.permute.xlu2 %453 }
 0x449   :  { %v1381_v59 = vadd.f32 %v454_v58, %v450_v57 }
 0x44b   :  { %1052 = vtanh.f32 %v1381_v59 }
 0x451   :  { %v1053_v60 = vpop.eup %1052 }
 0x452   :  { %v458_v62 = vmul.f32 %v1053_v60, %v446_v50 }
 0x454   :  { %460 = vrot.lane.b32.xlu2 %v458_v62, %s1105_s3 }
 0x4ae   :  { %v461_v17 = vpop.permute.xlu2 %460 }
 0x4af   :  { %995 = vmatmul.msk.f32.vlgmr.msrb.gmra.mxu2 %vm172_vm10, %v461_v17  ;;  %996 = vmatmul.msk.f32.vlgmr.msrb.gmra.mxu3 %vm172_vm10, %v461_v17 }
 0x4b0   :  { %856 = vmatpush.msrb.mxu2 %v1144_v0  ;;  %876 = vmatpush.msrb.mxu3 %v1149_v1  ;;  %v100_v0 = vpop.f32.mrf.mxu0  ;;  %v141_v1 = vpop.f32.mrf.mxu1 }
 0x4b2   :  { %857 = vmatpush.msrb.mxu2 %v1154_v2  ;;  %877 = vmatpush.msrb.mxu3 %v1161_v3  ;;  %v101_v2 = vadd.f32 %v100_v0, %v1312_v22  ;;  %v142_v3 = vadd.f32 %v141_v1, %v1314_v23 }
 0x4b4   :  { %858 = vmatpush.msrb.mxu2 %v1166_v4  ;;  %878 = vmatpush.msrb.mxu3 %v1171_v5 }
 0x4b6   :  { %859 = vmatpush.msrb.mxu2 %v1178_v6  ;;  %879 = vmatpush.msrb.mxu3 %v1183_v7 }
 0x4b8   :  { %860 = vmatpush.msrb.mxu2 %v1193_v9  ;;  %880 = vmatpush.msrb.mxu3 %v1198_v10  ;;  %v103_v49 = vpop.f32.mrf.mxu0  ;;  %v144_v50 = vpop.f32.mrf.mxu1 }
 0x4b9   :  { %v104_v57 = vadd.f32 %v103_v49, %v1312_v22  ;;  %v145_v58 = vadd.f32 %v144_v50, %v1314_v23 }
 0x4ba   :  { %861 = vmatpush.msrb.mxu2 %v1205_v11  ;;  %881 = vmatpush.msrb.mxu3 %v1210_v12 }
 0x4bc   :  { %862 = vmatpush.msrb.mxu2 %v1217_v13  ;;  %882 = vmatpush.msrb.mxu3 %v1222_v14 }
 0x4be   :  { %863 = vmatpush.msrb.mxu2 %v1229_v15  ;;  %883 = vmatpush.msrb.mxu3 %v1234_v16 }
 0x4c0   :  { %v1438_v51 = vpop.f32.mrf.mxu0  ;;  %v1440_v52 = vpop.f32.mrf.mxu1 }
 0x4c8   :  { %v1442_v53 = vpop.f32.mrf.mxu0  ;;  %v1444_v54 = vpop.f32.mrf.mxu1 }
 0x4d0   :  { %v1446_v55 = vpop.f32.mrf.mxu0  ;;  %v1448_v56 = vpop.f32.mrf.mxu1 }
 0x532   :  { %v481_v4 = vpop.f32.mrf.mxu2  ;;  %v501_v5 = vpop.f32.mrf.mxu3 }
 0x533   :  { %v504_v6 = vadd.f32 %v481_v4, %v101_v2  ;;  %v505_v7 = vadd.f32 %v501_v5, %v142_v3 }
 0x535   :  { %v997_v9 = vmul.f32 -1.442695, %v504_v6  ;;  %v998_v10 = vmul.f32 -1.442695, %v505_v7 }
 0x537   :  { %1054 = vpow2.f32 %v997_v9 }
 0x538   :  { %1056 = vpow2.f32 %v998_v10 }
 0x53d   :  { %v1055_v11 = vpop.eup %1054 }
 0x53e   :  { %v1057_v12 = vpop.eup %1056  ;;  %v512_v13 = vadd.f32 1.0, %v1055_v11 }
 0x53f   :  { %v513_v14 = vadd.f32 1.0, %v1057_v12 }
 0x540   :  { %1058 = vrcp.f32 %v512_v13  ;;  %v525_v28 = vand.u32 2147483648, %v512_v13  ;;  %vm519_vm2 = vweird.f32 %v512_v13  ;;  %v523_v30 = vand.u32 2147483647, %v512_v13 }
 0x541   :  { %1060 = vrcp.f32 %v513_v14  ;;  %v540_v21 = vand.u32 2147483648, %v513_v14  ;;  %v538_v25 = vand.u32 2147483647, %v513_v14  ;;  %vm534_vm15 = vweird.f32 %v513_v14 }
 0x542   :  { %v526_v35 = vor.u32 1.1754944e-38, %v525_v28  ;;  %vm524_vm5 = vcmp.eq.f32.partialorder %v523_v30, 8.507059e+37 }
 0x543   :  { %v541_v29 = vor.u32 1.1754944e-38, %v540_v21  ;;  %vm539_vm3 = vcmp.eq.f32.partialorder %v538_v25, 8.507059e+37 }
 0x546   :  { %v1059_v15 = vpop.eup %1058 }
 0x547   :  { %v1061_v16 = vpop.eup %1060  ;;  %v515_v61 = vmul.f32 %v1059_v15, %v512_v13  ;;  %vm520_vm14 = vweird.f32 %v1059_v15 }
 0x548   :  { %v530_v18 = vmul.f32 %v1061_v16, %v513_v14  ;;  %vm535_vm13 = vweird.f32 %v1061_v16  ;;  %vm521_vm4 = vmor %vm519_vm2, %vm520_vm14 }
 0x549   :  { %v516_v63 = vsub.f32 1.0, %v515_v61  ;;  %vm536_vm0 = vmor %vm534_vm15, %vm535_vm13 }
 0x54a   :  { %v531_v19 = vsub.f32 1.0, %v530_v18 }
 0x54b   :  { %v517_v20 = vmul.f32 %v1059_v15, %v516_v63 }
 0x54c   :  { %v532_v24 = vmul.f32 %v1061_v16, %v531_v19 }
 0x54d   :  { %v518_v26 = vadd.f32 %v1059_v15, %v517_v20 }
 0x54e   :  { %v533_v27 = vadd.f32 %v1061_v16, %v532_v24 }
 0x54f   :  { %v522_v33 = vsel %vm521_vm4, %v1059_v15, %v518_v26 }
 0x550   :  { %v537_v31 = vsel %vm536_vm0, %v1061_v16, %v533_v27  ;;  %v527_v37 = vsel %vm524_vm5, %v526_v35, %v522_v33 }
 0x551   :  { %v542_v32 = vsel %vm539_vm3, %v541_v29, %v537_v31  ;;  %v546_v42 = vmul.f32 %v527_v37, %v1381_v59 }
 0x552   :  { %v544_v34 = vmul.f32 2.0, %v542_v32 }
 0x554   :  { %v999_v36 = vadd.f32 -1.0, %v544_v34 }
 0x556   :  { %v547_v38 = vmul.f32 %v999_v36, %v527_v37  ;;  %v107_v36 = vadd.f32 %v1438_v51, %v1312_v22  ;;  %v148_v37 = vadd.f32 %v1440_v52, %v1314_v23 }
 0x558   :  { %549 = vrot.lane.b32.xlu0 %v547_v38, %s1105_s3 }
 0x5ca   :  { %v550_v43 = vpop.permute.xlu0 %549 }
 0x5cb   :  { %v1427_v44 = vadd.f32 %v550_v43, %v546_v42 }
 0x5cd   :  { %1062 = vtanh.f32 %v1427_v44 }
 0x5d3   :  { %v1063_v46 = vpop.eup %1062 }
 0x5d4   :  { %v554_v47 = vmul.f32 %v1063_v46, %v542_v32 }
 0x5d6   :  { %556 = vrot.lane.b32.xlu1 %v554_v47, %s1105_s3 }
 0x648   :  { %v557_v48 = vpop.permute.xlu1 %556 }
 0x649   :  { %1000 = vmatmul.msk.f32.vlgmr.msrb.gmra.mxu0 %vm172_vm10, %v557_v48  ;;  %1001 = vmatmul.msk.f32.vlgmr.msrb.gmra.mxu1 %vm172_vm10, %v557_v48 }
 0x6c6   :  { %v577_v59 = vpop.f32.mrf.mxu0  ;;  %v597_v60 = vpop.f32.mrf.mxu1 }
 0x6c7   :  { %v600_v62 = vadd.f32 %v577_v59, %v104_v57  ;;  %v601_v8 = vadd.f32 %v597_v60, %v145_v58 }
 0x6c9   :  { %v1002_v17 = vmul.f32 -1.442695, %v600_v62  ;;  %v1003_v0 = vmul.f32 -1.442695, %v601_v8 }
 0x6cb   :  { %1064 = vpow2.f32 %v1002_v17 }
 0x6cc   :  { %1066 = vpow2.f32 %v1003_v0 }
 0x6d1   :  { %v1065_v1 = vpop.eup %1064 }
 0x6d2   :  { %v1067_v2 = vpop.eup %1066  ;;  %v608_v3 = vadd.f32 1.0, %v1065_v1 }
 0x6d3   :  { %v609_v4 = vadd.f32 1.0, %v1067_v2 }
 0x6d4   :  { %1068 = vrcp.f32 %v608_v3  ;;  %v621_v18 = vand.u32 2147483648, %v608_v3  ;;  %vm615_vm9 = vweird.f32 %v608_v3  ;;  %v619_v19 = vand.u32 2147483647, %v608_v3 }
 0x6d5   :  { %1070 = vrcp.f32 %v609_v4  ;;  %v636_v13 = vand.u32 2147483648, %v609_v4  ;;  %v634_v15 = vand.u32 2147483647, %v609_v4  ;;  %vm630_vm7 = vweird.f32 %v609_v4 }
 0x6d6   :  { %v622_v26 = vor.u32 1.1754944e-38, %v621_v18  ;;  %vm620_vm13 = vcmp.eq.f32.partialorder %v619_v19, 8.507059e+37  ;;  %v110_v18 = vadd.f32 %v1442_v53, %v1312_v22 }
 0x6d7   :  { %v637_v63 = vor.u32 1.1754944e-38, %v636_v13  ;;  %vm635_vm11 = vcmp.eq.f32.partialorder %v634_v15, 8.507059e+37 }
 0x6da   :  { %v1069_v5 = vpop.eup %1068 }
 0x6db   :  { %v1071_v6 = vpop.eup %1070  ;;  %v611_v7 = vmul.f32 %v1069_v5, %v608_v3  ;;  %vm616_vm6 = vweird.f32 %v1069_v5 }
 0x6dc   :  { %v626_v9 = vmul.f32 %v1071_v6, %v609_v4  ;;  %vm631_vm1 = vweird.f32 %v1071_v6  ;;  %vm617_vm12 = vmor %vm615_vm9, %vm616_vm6 }
 0x6dd   :  { %v612_v10 = vsub.f32 1.0, %v611_v7  ;;  %vm632_vm8 = vmor %vm630_vm7, %vm631_vm1 }
 0x6de   :  { %v627_v11 = vsub.f32 1.0, %v626_v9 }
 0x6df   :  { %v613_v12 = vmul.f32 %v1069_v5, %v612_v10 }
 0x6e0   :  { %v628_v14 = vmul.f32 %v1071_v6, %v627_v11 }
 0x6e1   :  { %v614_v16 = vadd.f32 %v1069_v5, %v613_v12 }
 0x6e2   :  { %v629_v61 = vadd.f32 %v1071_v6, %v628_v14 }
 0x6e3   :  { %v618_v24 = vsel %vm617_vm12, %v1069_v5, %v614_v16 }
 0x6e4   :  { %v633_v20 = vsel %vm632_vm8, %v1071_v6, %v629_v61  ;;  %v623_v28 = vsel %vm620_vm13, %v622_v26, %v618_v24 }
 0x6e5   :  { %v638_v21 = vsel %vm635_vm11, %v637_v63, %v633_v20  ;;  %v642_v30 = vmul.f32 %v623_v28, %v1427_v44  ;;  %v151_v63 = vadd.f32 %v1444_v54, %v1314_v23 }
 0x6e6   :  { %v640_v25 = vmul.f32 2.0, %v638_v21 }
 0x6e8   :  { %v1004_v27 = vadd.f32 -1.0, %v640_v25 }
 0x6ea   :  { %v643_v29 = vmul.f32 %v1004_v27, %v623_v28 }
 0x6ec   :  { %645 = vrot.lane.b32.xlu2 %v643_v29, %s1105_s3 }
 0x746   :  { %v646_v31 = vpop.permute.xlu2 %645 }
 0x747   :  { %v648_v32 = vadd.f32 %v646_v31, %v642_v30 }
 0x749   :  { %1072 = vtanh.f32 %v648_v32 }
 0x74f   :  { %v1073_v33 = vpop.eup %1072 }
 0x750   :  { %v650_v34 = vmul.f32 %v1073_v33, %v638_v21 }
 0x752   :  { %652 = vrot.lane.b32.xlu0 %v650_v34, %s1105_s3 }
 0x7c4   :  { %v653_v35 = vpop.permute.xlu0 %652 }
 0x7c5   :  { %1005 = vmatmul.msk.f32.vlgmr.msra.gmra.mxu2 %vm172_vm10, %v653_v35  ;;  %1006 = vmatmul.msk.f32.vlgmr.msra.gmra.mxu3 %vm172_vm10, %v653_v35 }
 0x848   :  { %v673_v38 = vpop.f32.mrf.mxu2  ;;  %v693_v39 = vpop.f32.mrf.mxu3 }
 0x849   :  { %v696_v40 = vadd.f32 %v673_v38, %v107_v36  ;;  %v697_v41 = vadd.f32 %v693_v39, %v148_v37 }
 0x84b   :  { %v1007_v42 = vmul.f32 -1.442695, %v696_v40  ;;  %v1008_v43 = vmul.f32 -1.442695, %v697_v41 }
 0x84d   :  { %1074 = vpow2.f32 %v1007_v42 }
 0x84e   :  { %1076 = vpow2.f32 %v1008_v43 }
 0x853   :  { %v1075_v44 = vpop.eup %1074 }
 0x854   :  { %v1077_v45 = vpop.eup %1076  ;;  %v704_v46 = vadd.f32 1.0, %v1075_v44 }
 0x855   :  { %v705_v47 = vadd.f32 1.0, %v1077_v45 }
 0x856   :  { %1078 = vrcp.f32 %v704_v46  ;;  %v717_v0 = vand.u32 2147483648, %v704_v46  ;;  %vm711_vm3 = vweird.f32 %v704_v46  ;;  %v715_v2 = vand.u32 2147483647, %v704_v46 }
 0x857   :  { %1080 = vrcp.f32 %v705_v47  ;;  %v732_v59 = vand.u32 2147483648, %v705_v47  ;;  %v730_v62 = vand.u32 2147483647, %v705_v47  ;;  %vm726_vm0 = vweird.f32 %v705_v47 }
 0x858   :  { %v718_v7 = vor.u32 1.1754944e-38, %v717_v0  ;;  %vm716_vm1 = vcmp.eq.f32.partialorder %v715_v2, 8.507059e+37  ;;  %v154_v0 = vadd.f32 %v1448_v56, %v1314_v23 }
 0x859   :  { %v733_v1 = vor.u32 1.1754944e-38, %v732_v59  ;;  %vm731_vm4 = vcmp.eq.f32.partialorder %v730_v62, 8.507059e+37 }
 0x85c   :  { %v1079_v48 = vpop.eup %1078 }
 0x85d   :  { %v1081_v49 = vpop.eup %1080  ;;  %v707_v50 = vmul.f32 %v1079_v48, %v704_v46  ;;  %vm712_vm15 = vweird.f32 %v1079_v48 }
 0x85e   :  { %v722_v51 = vmul.f32 %v1081_v49, %v705_v47  ;;  %vm727_vm14 = vweird.f32 %v1081_v49  ;;  %vm713_vm5 = vmor %vm711_vm3, %vm712_vm15 }
 0x85f   :  { %v708_v57 = vsub.f32 1.0, %v707_v50  ;;  %vm728_vm2 = vmor %vm726_vm0, %vm727_vm14 }
 0x860   :  { %v723_v52 = vsub.f32 1.0, %v722_v51 }
 0x861   :  { %v709_v58 = vmul.f32 %v1079_v48, %v708_v57 }
 0x862   :  { %v724_v60 = vmul.f32 %v1081_v49, %v723_v52 }
 0x863   :  { %v710_v8 = vadd.f32 %v1079_v48, %v709_v58 }
 0x864   :  { %v725_v17 = vadd.f32 %v1081_v49, %v724_v60 }
 0x865   :  { %v714_v5 = vsel %vm713_vm5, %v1079_v48, %v710_v8  ;;  %v1022_v8 = vld [vmem:[%s1494_s4] ss:$0 sm:$0xff] }
 0x866   :  { %v729_v3 = vsel %vm728_vm2, %v1081_v49, %v725_v17  ;;  %v719_v10 = vsel %vm716_vm1, %v718_v7, %v714_v5  ;;  %v113_v17 = vadd.f32 %v1446_v55, %v1312_v22 }
 0x867   :  { %v734_v4 = vsel %vm731_vm4, %v733_v1, %v729_v3  ;;  %v738_v12 = vmul.f32 %v719_v10, %v648_v32 }
 0x868   :  { %v736_v6 = vmul.f32 2.0, %v734_v4 }
 0x86a   :  { %v1009_v9 = vadd.f32 -1.0, %v736_v6 }
 0x86c   :  { %v739_v11 = vmul.f32 %v1009_v9, %v719_v10 }
 0x86e   :  { %741 = vrot.lane.b32.xlu1 %v739_v11, %s1105_s3 }
 0x8e0   :  { %v742_v13 = vpop.permute.xlu1 %741 }
 0x8e1   :  { %v744_v14 = vadd.f32 %v742_v13, %v738_v12 }
 0x8e3   :  { %1082 = vtanh.f32 %v744_v14 }
 0x8e9   :  { %v1083_v15 = vpop.eup %1082 }
 0x8ea   :  { %v746_v16 = vmul.f32 %v1083_v15, %v734_v4 }
 0x8ec   :  { %748 = vrot.lane.b32.xlu2 %v746_v16, %s1105_s3 }
 0x946   :  { %v749_v61 = vpop.permute.xlu2 %748 }
 0x947   :  { %1010 = vmatmul.msk.f32.vlgmr.msra.gmra.mxu0 %vm172_vm10, %v749_v61  ;;  %1011 = vmatmul.msk.f32.vlgmr.msra.gmra.mxu1 %vm172_vm10, %v749_v61 }
 0x9c4   :  { %v769_v19 = vpop.f32.mrf.mxu0  ;;  %v789_v20 = vpop.f32.mrf.mxu1 }
 0x9c5   :  { %v792_v21 = vadd.f32 %v769_v19, %v110_v18  ;;  %v793_v24 = vadd.f32 %v789_v20, %v151_v63 }
 0x9c7   :  { %v1012_v25 = vmul.f32 -1.442695, %v792_v21  ;;  %v1013_v26 = vmul.f32 -1.442695, %v793_v24 }
 0x9c9   :  { %1084 = vpow2.f32 %v1012_v25 }
 0x9ca   :  { %1086 = vpow2.f32 %v1013_v26 }
 0x9cf   :  { %v1085_v27 = vpop.eup %1084 }
 0x9d0   :  { %v1087_v28 = vpop.eup %1086  ;;  %v800_v29 = vadd.f32 1.0, %v1085_v27 }
 0x9d1   :  { %v801_v30 = vadd.f32 1.0, %v1087_v28 }
 0x9d2   :  { %1088 = vrcp.f32 %v800_v29  ;;  %v813_v41 = vand.u32 2147483648, %v800_v29  ;;  %vm807_vm11 = vweird.f32 %v800_v29  ;;  %v811_v43 = vand.u32 2147483647, %v800_v29 }
 0x9d3   :  { %1090 = vrcp.f32 %v801_v30  ;;  %v828_v36 = vand.u32 2147483648, %v801_v30  ;;  %v826_v38 = vand.u32 2147483647, %v801_v30  ;;  %vm822_vm8 = vweird.f32 %v801_v30 }
 0x9d4   :  { %v814_v48 = vor.u32 1.1754944e-38, %v813_v41  ;;  %vm812_vm14 = vcmp.eq.f32.partialorder %v811_v43, 8.507059e+37 }
 0x9d5   :  { %v829_v42 = vor.u32 1.1754944e-38, %v828_v36  ;;  %vm827_vm12 = vcmp.eq.f32.partialorder %v826_v38, 8.507059e+37 }
 0x9d8   :  { %v1089_v31 = vpop.eup %1088 }
 0x9d9   :  { %v1091_v32 = vpop.eup %1090  ;;  %v803_v53 = vmul.f32 %v1089_v31, %v800_v29  ;;  %vm808_vm7 = vweird.f32 %v1089_v31 }
 0x9da   :  { %v818_v33 = vmul.f32 %v1091_v32, %v801_v30  ;;  %vm823_vm6 = vweird.f32 %v1091_v32  ;;  %vm809_vm13 = vmor %vm807_vm11, %vm808_vm7  ;;  %vm958_vm7 = vcmask 7168  }
 0x9db   :  { %v804_v34 = vsub.f32 1.0, %v803_v53  ;;  %vm824_vm9 = vmor %vm822_vm8, %vm823_vm6 }
 0x9dc   :  { %v819_v54 = vsub.f32 1.0, %v818_v33 }
 0x9dd   :  { %v805_v35 = vmul.f32 %v1089_v31, %v804_v34 }
 0x9de   :  { %v820_v37 = vmul.f32 %v1091_v32, %v819_v54 }
 0x9df   :  { %v806_v39 = vadd.f32 %v1089_v31, %v805_v35 }
 0x9e0   :  { %v821_v40 = vadd.f32 %v1091_v32, %v820_v37  ;;  %v11_v37 = vstv %s1495_s5 }
 0x9e1   :  { %v810_v46 = vsel %vm809_vm13, %v1089_v31, %v806_v39  ;;  %12 = vst [vmem:[#allocation2] sm:$0x1] %v11_v37 }
 0x9e2   :  { %v825_v44 = vsel %vm824_vm9, %v1091_v32, %v821_v40  ;;  %v815_v50 = vsel %vm812_vm14, %v814_v48, %v810_v46 }
 0x9e3   :  { %v830_v45 = vsel %vm827_vm12, %v829_v42, %v825_v44  ;;  %v834_v57 = vmul.f32 %v815_v50, %v744_v14 }
 0x9e4   :  { %v832_v47 = vmul.f32 2.0, %v830_v45 }
 0x9e6   :  { %v1014_v49 = vadd.f32 -1.0, %v832_v47 }
 0x9e8   :  { %v835_v51 = vmul.f32 %v1014_v49, %v815_v50  ;;  %v1023_v40 = vld [vmem:[#allocation2] ss:$0 sm:$0xff] }
 0x9ea   :  { %837 = vrot.lane.b32.xlu0 %v835_v51, %s1105_s3 }
 0x9f2   :  { %942 = vrot.lane.b32.xlu0 %v1022_v8, %s1105_s3 }
 0xa5c   :  { %v838_v52 = vpop.permute.xlu0 %837 }
 0xa5d   :  { %v840_v58 = vadd.f32 %v838_v52, %v834_v57 }
 0xa5f   :  { %1092 = vtanh.f32 %v840_v58 }
 0xa64   :  { %v943_v54 = vpop.permute.xlu0 %942 }
 0xa65   :  { %v1093_v59 = vpop.eup %1092 }
 0xa66   :  { %v842_v60 = vmul.f32 %v1093_v59, %v830_v45 }
 0xa68   :  { %844 = vrot.lane.b32.xlu1 %v842_v60, %s1105_s3 }
 0xada   :  { %v845_v62 = vpop.permute.xlu1 %844 }
 0xadb   :  { %1015 = vmatmul.msk.f32.vlgmr.msrb.gmra.mxu2 %vm172_vm10, %v845_v62  ;;  %1016 = vmatmul.msk.f32.vlgmr.msrb.gmra.mxu3 %vm172_vm10, %v845_v62 }
 0xb5e   :  { %v865_v1 = vpop.f32.mrf.mxu2  ;;  %v885_v2 = vpop.f32.mrf.mxu3 }
 0xb5f   :  { %v888_v3 = vadd.f32 %v865_v1, %v113_v17  ;;  %v889_v4 = vadd.f32 %v885_v2, %v154_v0 }
 0xb61   :  { %v1017_v5 = vmul.f32 -1.442695, %v888_v3  ;;  %v1018_v6 = vmul.f32 -1.442695, %v889_v4 }
 0xb63   :  { %1094 = vpow2.f32 %v1017_v5 }
 0xb64   :  { %1096 = vpow2.f32 %v1018_v6 }
 0xb69   :  { %v1095_v7 = vpop.eup %1094 }
 0xb6a   :  { %v1097_v9 = vpop.eup %1096  ;;  %v896_v10 = vadd.f32 1.0, %v1095_v7 }
 0xb6b   :  { %v897_v11 = vadd.f32 1.0, %v1097_v9 }
 0xb6c   :  { %1098 = vrcp.f32 %v896_v10  ;;  %v909_v19 = vand.u32 2147483648, %v896_v10  ;;  %vm903_vm4 = vweird.f32 %v896_v10  ;;  %v907_v21 = vand.u32 2147483647, %v896_v10 }
 0xb6d   :  { %1100 = vrcp.f32 %v897_v11  ;;  %v924_v15 = vand.u32 2147483648, %v897_v11  ;;  %v922_v61 = vand.u32 2147483647, %v897_v11  ;;  %vm918_vm2 = vweird.f32 %v897_v11 }
 0xb6e   :  { %v910_v28 = vor.u32 1.1754944e-38, %v909_v19  ;;  %vm908_vm6 = vcmp.eq.f32.partialorder %v907_v21, 8.507059e+37 }
 0xb6f   :  { %v925_v20 = vor.u32 1.1754944e-38, %v924_v15  ;;  %vm923_vm5 = vcmp.eq.f32.partialorder %v922_v61, 8.507059e+37 }
 0xb72   :  { %v1099_v12 = vpop.eup %1098 }
 0xb73   :  { %v1101_v13 = vpop.eup %1100  ;;  %v899_v22 = vmul.f32 %v1099_v12, %v896_v10  ;;  %vm904_vm0 = vweird.f32 %v1099_v12 }
 0xb74   :  { %v914_v55 = vmul.f32 %v1101_v13, %v897_v11  ;;  %vm919_vm15 = vweird.f32 %v1101_v13  ;;  %vm905_vm1 = vmor %vm903_vm4, %vm904_vm0 }
 0xb75   :  { %v900_v14 = vsub.f32 1.0, %v899_v22  ;;  %vm920_vm3 = vmor %vm918_vm2, %vm919_vm15 }
 0xb76   :  { %v915_v23 = vsub.f32 1.0, %v914_v55 }
 0xb77   :  { %v901_v56 = vmul.f32 %v1099_v12, %v900_v14 }
 0xb78   :  { %v916_v16 = vmul.f32 %v1101_v13, %v915_v23 }
 0xb79   :  { %v902_v18 = vadd.f32 %v1099_v12, %v901_v56 }
 0xb7a   :  { %v917_v63 = vadd.f32 %v1101_v13, %v916_v16 }
 0xb7b   :  { %v906_v26 = vsel %vm905_vm1, %v1099_v12, %v902_v18 }
 0xb7c   :  { %v921_v24 = vsel %vm920_vm3, %v1101_v13, %v917_v63  ;;  %v911_v30 = vsel %vm908_vm6, %v910_v28, %v906_v26 }
 0xb7d   :  { %v926_v25 = vsel %vm923_vm5, %v925_v20, %v921_v24  ;;  %v930_v32 = vmul.f32 %v911_v30, %v840_v58 }
 0xb7e   :  { %v928_v27 = vmul.f32 2.0, %v926_v25 }
 0xb80   :  { %v1019_v29 = vadd.f32 -1.0, %v928_v27 }
 0xb82   :  { %v931_v31 = vmul.f32 %v1019_v29, %v911_v30 }
 0xb84   :  { %933 = vrot.lane.b32.xlu2 %v931_v31, %s1105_s3 }
 0xbde   :  { %v934_v53 = vpop.permute.xlu2 %933 }
 0xbdf   :  { %v936_v33 = vadd.f32 %v934_v53, %v930_v32 }
 0xbe1   :  { %1102 = vtanh.f32 %v936_v33 }
 0xbe7   :  { %v1103_v34 = vpop.eup %1102 }
 0xbe8   :  { %v938_v35 = vmul.f32 %v1103_v34, %v926_v25 }
 0xbea   :  { %v945_v36 = vmul.f32 %v943_v54, %v938_v35 }
 0xbec   :  { %947 = vrot.lane.b32.xlu1 %v945_v36, %s1105_s3 }
 0xc5e   :  { %v948_v38 = vpop.permute.xlu1 %947 }
 0xc5f   :  { %v950_v39 = vsel %vm172_vm10, %v948_v38, 0.0 }
 0xc60   :  { %951 = vadd.xlane.f32.xlu2 %v950_v39 }
 0xcd3   :  { %v952_v41 = vpop.xlane.xlu2 %951 }
 0xcd4   :  { %v957_v42 = vadd.f32 %v1023_v40, %v952_v41 }
 0xcd6   :  { %959 = vst.msk [vmem:[%s1496_s6] sm:$0xff] %vm958_vm7, %v957_v42 }

</bundles_post_ra>
